<compile_context>
chip_gen: v7x
topology: tpu7x:2x2x1
jax: 0.10.0
libtpu: 0.0.40
codegen_flags: <defaults>
</compile_context>

<pallas_src>
import functools

import jax
import jax.numpy as jnp
from jax import lax
from jax.experimental import pallas as pl
from jax.experimental.pallas import tpu as pltpu

_EPS = 1e-5                                # nn.LayerNorm default eps
_VMEM_TILE_BUDGET = 32 * 1024 * 1024       # bytes budgeted for pipelined tiles
_VMEM_LIMIT_BYTES = 48 * 1024 * 1024       # scoped-VMEM limit (headroom on v7x's 64 MiB)
_MAX_ROW_TILE = 1024                       # beyond this we're already at HBM roofline


def _round_up(x, m):
    return ((x + m - 1) // m) * m


def _choose_row_tile(n_rows, hidden, io_dtype):
    """Largest row tile (multiple of 8) that fits the VMEM budget."""
    io_bytes = jnp.dtype(io_dtype).itemsize
    # Per-row VMEM cost of one pipeline step:
    #   2 inputs + 1 output, each double-buffered (x2), in the I/O dtype,
    #   plus ~2 full f32 intermediates materialized by the kernel body.
    per_row = (3 * 2 * io_bytes + 2 * 4) * hidden
    rows = max(8, _VMEM_TILE_BUDGET // per_row)
    rows = min(rows, _MAX_ROW_TILE)
    # Keep at least 2 grid steps when there is enough work so the single
    # parallel axis can be split across v7x's two TensorCores.
    if n_rows > 8:
        rows = min(rows, _round_up(pl.cdiv(n_rows, 2), 8))
    return max(8, (rows // 8) * 8)


def _addnorm_kernel(res_ref, x_ref, gamma_ref, beta_ref, o_ref):
    # "Add" (residual + X) in f32, then LayerNorm over the last (lane) axis.
    x = x_ref[...].astype(jnp.float32) + res_ref[...].astype(jnp.float32)
    mean = jnp.mean(x, axis=-1, keepdims=True)            # XLU reduction
    centered = x - mean
    var = jnp.mean(centered * centered, axis=-1, keepdims=True)  # biased (torch)
    inv = lax.rsqrt(var + _EPS)                            # EUP
    y = centered * inv * gamma_ref[...].astype(jnp.float32) \
        + beta_ref[...].astype(jnp.float32)
    o_ref[...] = y.astype(o_ref.dtype)


@jax.jit
def addnorm(residual, x, gamma, beta):
    """residual, x: (..., H); gamma, beta: (H,). Returns LayerNorm(x + residual)."""
    orig_shape = x.shape
    H = orig_shape[-1]
    x2 = x.reshape(-1, H)
    r2 = residual.reshape(-1, H)
    N = x2.shape[0]

    row_tile = _choose_row_tile(N, H, x.dtype)
    grid_len = pl.cdiv(N, row_tile)
    n_pad = grid_len * row_tile

    # Handle ragged tail by zero-padding the row axis (padded rows produce
    # finite garbage that is sliced off below).
    if n_pad != N:
        pad = n_pad - N
        x2 = jnp.pad(x2, ((0, pad), (0, 0)))
        r2 = jnp.pad(r2, ((0, pad), (0, 0)))

    gamma2 = gamma.reshape(1, H)
    beta2 = beta.reshape(1, H)

    # NOTE: block last dim == full H keeps stores lane-dense when H is a
    # multiple of 128 (typical transformer hidden sizes).  For small H (e.g.
    # the 32-wide test below) the block equals the full array dim, which is
    # legal but underutilizes lanes — XLA fusion would be competitive there.
    out = pl.pallas_call(
        _addnorm_kernel,
        out_shape=jax.ShapeDtypeStruct((n_pad, H), x.dtype),
        grid_spec=pltpu.PrefetchScalarGridSpec(
            num_scalar_prefetch=0,
            grid=(grid_len,),
            in_specs=[
                pl.BlockSpec((row_tile, H), lambda i: (i, 0)),   # residual tile
                pl.BlockSpec((row_tile, H), lambda i: (i, 0)),   # X tile
                pl.BlockSpec((1, H), lambda i: (0, 0)),          # gamma (broadcast)
                pl.BlockSpec((1, H), lambda i: (0, 0)),          # beta  (broadcast)
            ],
            out_specs=pl.BlockSpec((row_tile, H), lambda i: (i, 0)),
        ),
        compiler_params=pltpu.CompilerParams(
            dimension_semantics=("parallel",),
            vmem_limit_bytes=_VMEM_LIMIT_BYTES,
        ),
    )(r2, x2, gamma2, beta2)

    if n_pad != N:
        out = out[:N]
    return out.reshape(orig_shape)


def _reference(residual, x, gamma, beta):
    y = x.astype(jnp.float32) + residual.astype(jnp.float32)
    mean = jnp.mean(y, axis=-1, keepdims=True)
    var = jnp.mean((y - mean) ** 2, axis=-1, keepdims=True)
    return ((y - mean) / jnp.sqrt(var + _EPS)) * gamma.astype(jnp.float32) \
        + beta.astype(jnp.float32)


if __name__ == "__main__":
    key = jax.random.PRNGKey(0)
    k1, k2, k3, k4 = jax.random.split(key, 4)

    # --- f32 case (matches the module's default small shapes) ---
    batch, seq, hidden = 2, 8, 32   # normalized_shape = hidden = 32
    residual = jax.random.normal(k1, (batch, seq, hidden), dtype=jnp.float32)
    x = jax.random.normal(k2, (batch, seq, hidden), dtype=jnp.float32)
    gamma = 1.0 + 0.1 * jax.random.normal(k3, (hidden,), dtype=jnp.float32)
    beta = 0.1 * jax.random.normal(k4, (hidden,), dtype=jnp.float32)

    out = jax.block_until_ready(addnorm(residual, x, gamma, beta))
    ref = _reference(residual, x, gamma, beta)
    assert out.shape == x.shape and out.dtype == x.dtype
    assert jnp.allclose(out, ref, atol=1e-5, rtol=1e-5), "f32 mismatch vs reference"

    # --- ragged-row + bf16 case (exercises tail padding and dtype cast) ---
    b2, s2 = 3, 5                    # 15 rows: not a multiple of the row tile
    r_bf = jax.random.normal(k1, (b2, s2, hidden), dtype=jnp.bfloat16)
    x_bf = jax.random.normal(k2, (b2, s2, hidden), dtype=jnp.bfloat16)
    out_bf = jax.block_until_ready(addnorm(r_bf, x_bf, gamma, beta))
    ref_bf = _reference(r_bf, x_bf, gamma, beta)
    assert out_bf.shape == x_bf.shape and out_bf.dtype == jnp.bfloat16
    assert jnp.allclose(out_bf.astype(jnp.float32), ref_bf, atol=5e-2, rtol=5e-2), \
        "bf16 mismatch vs reference"

    print("KERNEL_OK")
</pallas_src>

<mosaic_0001>
module attributes {stable_mosaic.version = 11 : i64} {
  func.func @_addnorm_kernel(%arg0: i32, %arg1: memref<8x32xf32, #tpu.memory_space<vmem>>, %arg2: memref<8x32xf32, #tpu.memory_space<vmem>>, %arg3: memref<1x32xf32, #tpu.memory_space<vmem>>, %arg4: memref<1x32xf32, #tpu.memory_space<vmem>>, %arg5: memref<8x32xf32, #tpu.memory_space<vmem>>) attributes {dimension_semantics = [#tpu.dimension_semantics<parallel>], iteration_bounds = array<i64: 2>, scalar_prefetch = 0 : i64, scratch_operands = 0 : i64, tpu.core_type = #tpu.core_type<tc>, window_params = [{transform_indices = @transform_0, window_bounds = array<i64: 8, 32>}, {transform_indices = @transform_1, window_bounds = array<i64: 8, 32>}, {pipeline_mode = #tpu.pipeline_mode<synchronous>, transform_indices = @transform_2, window_bounds = array<i64: 1, 32>}, {pipeline_mode = #tpu.pipeline_mode<synchronous>, transform_indices = @transform_3, window_bounds = array<i64: 1, 32>}, {transform_indices = @transform_4, window_bounds = array<i64: 8, 32>}]} {
    %c0 = arith.constant 0 : index
    %c0_0 = arith.constant 0 : index
    %0 = vector.load %arg2[%c0, %c0_0] : memref<8x32xf32, #tpu.memory_space<vmem>>, vector<8x32xf32>
    %c0_1 = arith.constant 0 : index
    %c0_2 = arith.constant 0 : index
    %1 = vector.load %arg1[%c0_1, %c0_2] : memref<8x32xf32, #tpu.memory_space<vmem>>, vector<8x32xf32>
    %2 = arith.addf %0, %1 : vector<8x32xf32>
    %cst = arith.constant dense<0.000000e+00> : vector<8xf32>
    %3 = vector.multi_reduction <add>, %2, %cst [1] : vector<8x32xf32> to vector<8xf32>
    %4 = vector.shape_cast %3 : vector<8xf32> to vector<8x1xf32>
    %cst_3 = arith.constant 3.200000e+01 : f32
    %5 = vector.broadcast %cst_3 : f32 to vector<8x1xf32>
    %6 = arith.divf %4, %5 : vector<8x1xf32>
    %7 = vector.broadcast %6 : vector<8x1xf32> to vector<8x32xf32>
    %8 = arith.subf %2, %7 : vector<8x32xf32>
    %9 = arith.mulf %8, %8 : vector<8x32xf32>
    %cst_4 = arith.constant dense<0.000000e+00> : vector<8xf32>
    %10 = vector.multi_reduction <add>, %9, %cst_4 [1] : vector<8x32xf32> to vector<8xf32>
    %11 = vector.shape_cast %10 : vector<8xf32> to vector<8x1xf32>
    %cst_5 = arith.constant 3.200000e+01 : f32
    %12 = vector.broadcast %cst_5 : f32 to vector<8x1xf32>
    %13 = arith.divf %11, %12 : vector<8x1xf32>
    %cst_6 = arith.constant 9.99999974E-6 : f32
    %14 = vector.broadcast %cst_6 : f32 to vector<8x1xf32>
    %15 = arith.addf %13, %14 : vector<8x1xf32>
    %16 = math.rsqrt %15 : vector<8x1xf32>
    %17 = vector.broadcast %16 : vector<8x1xf32> to vector<8x32xf32>
    %18 = arith.mulf %8, %17 : vector<8x32xf32>
    %c0_7 = arith.constant 0 : index
    %c0_8 = arith.constant 0 : index
    %19 = vector.load %arg3[%c0_7, %c0_8] : memref<1x32xf32, #tpu.memory_space<vmem>>, vector<1x32xf32>
    %20 = vector.broadcast %19 : vector<1x32xf32> to vector<8x32xf32>
    %21 = arith.mulf %18, %20 : vector<8x32xf32>
    %c0_9 = arith.constant 0 : index
    %c0_10 = arith.constant 0 : index
    %22 = vector.load %arg4[%c0_9, %c0_10] : memref<1x32xf32, #tpu.memory_space<vmem>>, vector<1x32xf32>
    %23 = vector.broadcast %22 : vector<1x32xf32> to vector<8x32xf32>
    %24 = arith.addf %21, %23 : vector<8x32xf32>
    %c0_11 = arith.constant 0 : index
    %c0_12 = arith.constant 0 : index
    %25 = vector.load %arg5[%c0_11, %c0_12] : memref<8x32xf32, #tpu.memory_space<vmem>>, vector<8x32xf32>
    tpu.vector_store %arg5[%c0_11, %c0_12], %24 {strides = array<i32>} : memref<8x32xf32, #tpu.memory_space<vmem>>, vector<8x32xf32>,
    return
  }
  func.func @transform_0(%arg0: i32) -> (i32, i32) {
    %c0_i32 = arith.constant 0 : i32
    %c0_i32_0 = arith.constant 0 : i32
    return %arg0, %c0_i32 : i32, i32
  }
  func.func @transform_1(%arg0: i32) -> (i32, i32) {
    %c0_i32 = arith.constant 0 : i32
    %c0_i32_0 = arith.constant 0 : i32
    return %arg0, %c0_i32 : i32, i32
  }
  func.func @transform_2(%arg0: i32) -> (i32, i32) {
    %c0_i32 = arith.constant 0 : i32
    %c0_i32_0 = arith.constant 0 : i32
    %c0_i32_1 = arith.constant 0 : i32
    return %c0_i32, %c0_i32_0 : i32, i32
  }
  func.func @transform_3(%arg0: i32) -> (i32, i32) {
    %c0_i32 = arith.constant 0 : i32
    %c0_i32_0 = arith.constant 0 : i32
    %c0_i32_1 = arith.constant 0 : i32
    return %c0_i32, %c0_i32_0 : i32, i32
  }
  func.func @transform_4(%arg0: i32) -> (i32, i32) {
    %c0_i32 = arith.constant 0 : i32
    %c0_i32_0 = arith.constant 0 : i32
    return %arg0, %c0_i32 : i32, i32
  }
}

</mosaic_0001>

<bundles_post_ra>
// kernel: addnorm.1
= control target key start
LH: loop header
LB: loop body
LE: loop exit
PB: predicated region body
PF: predicated region fallthrough
CT: control target
= control target key end

     0   :  { %9 = vsyncpa [#allocation3], 0  ;;  %s728_s0 = inlined_call_operand.hbm [shape: f32[16,32], index: 0, kind: input, shape index: {}]   ;;  %s729_s1 = inlined_call_operand.vmem [shape: f32[16,32], index: 1, kind: input, shape index: {}]   ;;  %s730_s2 = inlined_call_operand.vmem [shape: f32[1,32], index: 2, kind: input, shape index: {}]   ;;  %s731_s3 = inlined_call_operand.vmem [shape: f32[1,32], index: 3, kind: input, shape index: {}]   ;;  %s732_s4 = inlined_call_operand.hbm [shape: f32[16,32], index: 4, kind: output, shape index: {}]  }
   0x1   :  { %11 = vsyncpa [#allocation3 + $0x1], 0 }
   0x2   :  { %12 = vsyncpa [#allocation4], 0 }
   0x3   :  { %14 = vsyncpa [#allocation4 + $0x1], 0  ;;  %s549_s15 = smov 0   ;;  %s551_s16 = smov 0  }
   0x4   :  { %s553_s17 = smov 0   ;;  %s555_s18 = smov 0  }
   0x5 LB: > { %s570_s19 = sadd.s32 4294967295, %s520_s18   ;;  %s361_s20 = sadd.s32 4294967294, %s520_s18   ;;  %s520_s18 = sphi %s555_s18, %s747_s18   ;;  %s516_s17 = sphi %s553_s17, %s746_s17   ;;  %s512_s16 = sphi %s551_s16, %s745_s16   ;;  %s508_s15 = sphi %s549_s15, %s744_s15  }
   0x6   : > { %s574_s21 = sadd.s32 1, %s520_s18   ;;  %s27_s22 = sadd.s32 1, %s516_s17 }
   0x7   : > { %s24_s23 = ssub.s32 %s520_s18, %s574_s21  ;;  %p34_p0 = scmp.ne.s32.totalorder %s516_s17, %s512_s16 }
   0x8   : > { %p25_p1 = scmp.eq.s32.totalorder %s24_s23, 0  ;;  %p35_p2 = scmp.eq.s32.totalorder %s520_s18, 0 }
   0x9   : > { %p40_p3 = scmp.ne.s32.totalorder %s512_s16, %s508_s15  ;;  %p41_p4 = scmp.eq.s32.totalorder %s570_s19, 0 }
   0xa   : > { %s586_s24 = scalar_select %p25_p1, %s516_s17, %s27_s22  }
   0xb   : > { %p588_p5 = por %p35_p2, %p34_p0  ;;  %p592_p6 = por %p41_p4, %p40_p3 }
   0xc   : > { %p132_p7 = scmp.eq.s32.totalorder %s570_s19, 1  ;;  %p138_p8 = scmp.eq.s32.totalorder %s361_s20, 1 }
   0xd   : > { %p388_p10 = scmp.lt.s32.totalorder %s520_s18, 2  ;;  %s164_s29 = sand.u32 1, %s516_s17  }
   0xe   : > { %p599_p11 = por %p132_p7, %p34_p0  ;;  %p603_p12 = por %p138_p8, %p40_p3 }
   0xf   : > { %s365_s30 = sshll.u32 %s520_s18, 7  ;;  %s364_s5 = sshll.u32 %s164_s29, 3 }
  0x10   : > { %s736_s27 = scalar_select %p599_p11, 1, 0 }
  0x11   : > { %s737_s28 = scalar_select %p603_p12, 1, 0 }
  0x12   : > { %s612_s8 = scalar_lea.hbm %s728_s0, %s365_s30  ;;  %s168_s9 = scalar_lea.vmem [#allocation2], %s364_s5 }
  0x13   : > { %s175_s10 = sshll.u32 %s168_s9, 4  ;;  %p616_p13 = pnand %p388_p10, %p588_p5  ;;  %s620_s10 = int_to_ptr.vmem [resolvable:$true] %s175_s10 }
  0x14   : > { %s165_s12 = scalar_lea.sflag [#allocation3], %s164_s29  ;;  %s424_s13 = scalar_lea.hbm %s612_s8, 128 }
  0x15   : > { %p425_p2 = scmp.ne.s32.totalorder %s612_s8, %s424_s13  ;;  %p426_p3 = pneg %p616_p13 }
  0x16   : > { %s429_s22 = scalar_lea.hbm %s728_s0, 256  ;;  %p430_p5 = scmp.lt.u32.totalorder %s612_s8, %s728_s0 }
  0x17   : > { %p427_p4 = pnand %p426_p3, %p425_p2  ;;  %p431_p8 = scmp.lt.u32.totalorder %s429_s22, %s424_s13 }
  0x18   : > { %p433_p9 = scmp.lt.u32.totalorder %s424_s13, %s612_s8 }
  0x19   : > { %p428_p7 = pneg %p427_p4  ;;  %p432_p10 = por %p431_p8, %p430_p5 }
  0x1b   : > { %p434_p0 = por %p433_p9, %p432_p10 }
  0x1d   : > { %p435_p1 = pnand %p434_p0, %p428_p7 }
  0x1f   : > { %438 = shalt.err (!%p435_p1)
}
  0x20   : > { %s439_s29 = scalar_lea.vmem %s620_s10, 128  ;;  %s522_s30 = smov [#allocation2]  }
  0x21   : > { %p440_p2 = scmp.ne.s32.totalorder %s620_s10, %s439_s29  ;;  %s444_s5 = sshll.u32 %s522_s30, 4  ;;  %s445_s5 = int_to_ptr.vmem [resolvable:$false] %s444_s5 }
  0x22   : > { %s446_s6 = scalar_lea.vmem %s445_s5, 256  ;;  %p447_p11 = scmp.lt.s32.totalorder %s620_s10, %s445_s5 }
  0x23   : > { %p442_p4 = pnand %p440_p2, %p426_p3  ;;  %p448_p5 = scmp.lt.s32.totalorder %s446_s6, %s439_s29 }
  0x25   : > { %p443_p12 = pneg %p442_p4  ;;  %p449_p8 = por %p448_p5, %p447_p11 }
  0x27   : > { %p450_p9 = pnand %p449_p8, %p443_p12 }
  0x29   : > { %453 = shalt.err (!%p450_p9)
}
  0x2a   : > { %383 = dma.hbm_to_vmem [thread:$0]  (!%p616_p13), %s612_s8, 128, %s620_s10, %s165_s12  }
  0x2b   : > { %p739_p0 = scmp.lt.s32.totalorder %s520_s18, 3  ;;  %p740_p1 = scmp.ge.s32.totalorder %s520_s18, 1 }
  0x2d   : > { %p188_p3 = pnand %p740_p1, %p739_p0 }
  0x2e   : > { %s654_s7 = sand.u32 (!%p188_p3), 1, %s512_s16  }
  0x2f   : > { %191 = sbr.rel (%p188_p3) target bundleno = 391 (0x187), region = 36  ;;  %s367_s9 = sshll.u32 (!%p188_p3), %s654_s7, 3 }
  0x30   : > { %s194_s13 = scalar_lea.sflag (!%p188_p3), [#allocation3], %s654_s7  ;;  %s197_s11 = scalar_lea.vmem (!%p188_p3), [#allocation2], %s367_s9 }
  0x36   : > { %499 = dma.done.wait (%p592_p6), %s194_s13, 128  }
  0x37   : > { %501 = vsyncadd (%p592_p6), %s194_s13, 4294967168  ;;  %p226_p11 = scmp.lt.s32.totalorder %s570_s19, 1  ;;  %v231_v1 = vld [vmem:[%s197_s11] sm:$0xff]  ;;  %vm233_vm0 = vcmask 261120   ;;  %s373_s29 = sshll.u32 %s570_s19, 7 }
  0x38   : > { %v370_v13 = vld [vmem:[%s730_s2] ss:$0 sm:$0xff]  ;;  %s225_s30 = scalar_lea.vmem [#allocation5], %s367_s9  ;;  %s683_s11 = scalar_lea.hbm %s732_s4, %s373_s29 }
  0x39   : > { %s227_s8 = scalar_select %p226_p11, %s570_s19, 1  ;;  %v371_v15 = vld [vmem:[%s731_s3] ss:$0 sm:$0xff] }
  0x3a   : > { %s279_s5 = sshll.u32 %s225_s30, 4  ;;  %p741_p12 = scmp.ne.s32.totalorder %s736_s27, 0  ;;  %s685_s5 = int_to_ptr.vmem [resolvable:$true] %s279_s5 }
  0x3b   : > { %s369_s10 = sshll.u32 %s227_s8, 3  ;;  %s266_s8 = scalar_lea.sflag [#allocation4], %s654_s7 }
  0x3c   : > { %s229_s20 = scalar_lea.vmem %s729_s1, %s369_s10  ;;  %s454_s10 = scalar_lea.vmem %s685_s5, 128 }
  0x3d   : > { %v230_v0 = vld [vmem:[%s229_s20] sm:$0xff]  ;;  %p455_p6 = scmp.ne.s32.totalorder %s685_s5, %s454_s10  ;;  %s523_s19 = smov [#allocation5]  }
  0x3e   : > { %v232_v2 = vadd.f32 %v231_v1, %v230_v0  ;;  %s458_s9 = sshll.u32 %s523_s19, 4  ;;  %s459_s9 = int_to_ptr.vmem [resolvable:$false] %s458_s9 }
  0x3f   : > { %p456_p13 = pnand %p455_p6, %p741_p12  ;;  %s460_s12 = scalar_lea.vmem %s459_s9, 256 }
  0x40   : > { %v234_v3 = vsel %vm233_vm0, %v232_v2, 0.0  ;;  %p461_p10 = scmp.lt.s32.totalorder %s685_s5, %s459_s9  ;;  %p462_p2 = scmp.lt.s32.totalorder %s460_s12, %s454_s10 }
  0x41   : > { %235 = vadd.xlane.f32.xlu0 %v234_v3  ;;  %p457_p7 = pneg %p456_p13 }
  0x42   : > { %p463_p4 = por %p462_p2, %p461_p10 }
  0x44   : > { %p464_p5 = pnand %p463_p4, %p457_p7 }
  0xce   : > { %v236_v4 = vpop.xlane.xlu0 %235 }
  0xcf   : > { %v238_v5 = vmul.f32 0.03125, %v236_v4 }
  0xd1   : > { %v239_v6 = vsub.f32 %v232_v2, %v238_v5 }
  0xd3   : > { %v240_v7 = vmul.f32 %v239_v6, %v239_v6 }
  0xd5   : > { %v241_v8 = vsel %vm233_vm0, %v240_v7, 0.0 }
  0xd6   : > { %242 = vadd.xlane.f32.xlu0 %v241_v8 }
 0x163   : > { %v243_v9 = vpop.xlane.xlu0 %242 }
 0x164   : > { %v244_v10 = vmul.f32 0.03125, %v243_v9 }
 0x166   : > { %v245_v11 = vadd.f32 1e-05, %v244_v10 }
 0x168   : > { %422 = vrsqrt.f32 %v245_v11 }
 0x172   : > { %v423_v12 = vpop.eup %422 }
 0x173   : > { %v247_v14 = vmul.f32 %v423_v12, %v239_v6 }
 0x175   : > { %v255_v16 = vmul.f32 %v370_v13, %v247_v14 }
 0x177   : > { %v263_v17 = vadd.f32 %v371_v15, %v255_v16 }
 0x179   : > { %264 = vst.msk [vmem:[%s225_s30] sm:$0xff] %vm233_vm0, %v263_v17 }
 0x17a   : > { %467 = shalt.err (!%p464_p5)
}
 0x17b   : > { %s468_s7 = scalar_lea.hbm %s683_s11, 128  ;;  %s472_s26 = scalar_lea.hbm %s732_s4, 256 }
 0x17c   : > { %p469_p8 = scmp.ne.s32.totalorder %s683_s11, %s468_s7  ;;  %p473_p1 = scmp.lt.u32.totalorder %s683_s11, %s732_s4 }
 0x17d   : > { %p474_p3 = scmp.lt.u32.totalorder %s472_s26, %s468_s7  ;;  %p476_p6 = scmp.lt.u32.totalorder %s468_s7, %s683_s11 }
 0x17e   : > { %p470_p9 = pnand %p469_p8, %p741_p12 }
 0x17f   : > { %p475_p11 = por %p474_p3, %p473_p1 }
 0x180   : > { %p471_p0 = pneg %p470_p9 }
 0x181   : > { %p477_p13 = por %p476_p6, %p475_p11 }
 0x183   : > { %p478_p7 = pnand %p477_p13, %p471_p0 }
 0x185   : > { %481 = shalt.err (!%p478_p7)
}
 0x186   : > { %378 = dma.vmem_to_hbm [thread:$0]  (%p741_p12), %s685_s5, 128, %s683_s11, %s266_s8  }
 0x187 PF: > { %s291_s25 = sand.u32 1, %s508_s15   ;;  %p742_p10 = scmp.ne.s32.totalorder %s737_s28, 0 }
 0x188   : > { %p743_p2 = scmp.ge.s32.totalorder %s520_s18, 2  ;;  %s292_s29 = scalar_lea.sflag [#allocation4], %s291_s25 }
 0x18a   : > { %p385_p4 = pnand %p743_p2, %p742_p10 }
 0x18c   : > { %503 = dma.done.wait (!%p385_p4), %s292_s29, 128  }
 0x18d   : > { %505 = vsyncadd (!%p385_p4), %s292_s29, 4294967168  ;;  %p17_p5 = scmp.ge.s32.totalorder %s574_s21, 4   ;;  %s744_s15 = smov %s512_s16 }
 0x18e   : > { %s745_s16 = smov %s516_s17  ;;  %s746_s17 = smov %s586_s24 }
 0x18f   : > { %s747_s18 = smov %s574_s21  ;;  %19 = sbr.rel (!%p17_p5) target bundleno = 5 (0x5), region = 84 }
 0x196   :  { %297 = vsyncpa [#allocation3], 1 }
 0x197   :  { %299 = vsyncpa [#allocation3 + $0x1], 1 }
 0x198   :  { %300 = vsyncpa [#allocation4], 1 }
 0x199   :  { %302 = vsyncpa [#allocation4 + $0x1], 1 }

</bundles_post_ra>
